<compile_context>
chip_gen: v5e
topology: v5e:2x2
jax: 0.10.0
libtpu: 0.0.40
codegen_flags: <defaults>
</compile_context>

<pallas_src>
import jax
import jax.numpy as jnp
from jax.experimental import pallas as pl
from jax.experimental.pallas import tpu as pltpu


def _dino_rnn_fc_kernel(x_ref, h0_ref, p_rnn_ref, p_fc_ref, y_ref):
    """Single-invocation RNN(tanh) + Linear forward, everything VMEM-resident.

    x_ref   : (T, B, I)   input, TIME-major so each step is a leading-axis view
    h0_ref  : (1, B, H)   initial hidden state (nn.RNN layout, layer 0)
    p_rnn   : (I+H+1, H)  packed [W_ih^T ; W_hh^T ; (b_ih + b_hh)]
    p_fc    : (H+1,  O)   packed [W_fc^T ; b_fc]
    y_ref   : (B*T, O)    output, batch-first row order (== out.view(B*T, H) -> fc)
    """
    T, B, I = x_ref.shape
    H = p_rnn_ref.shape[1]
    O = p_fc_ref.shape[1]

    # Static (sublane-aligned for I=16, H=32) slices of the packed parameter blocks.
    w_ih = p_rnn_ref[0:I, :]                   # (I, H)
    w_hh = p_rnn_ref[I:I + H, :]               # (H, H)
    b    = p_rnn_ref[I + H:I + H + 1, :]       # (1, H)  fused b_ih + b_hh
    w_fc = p_fc_ref[0:H, :]                    # (H, O)
    b_fc = p_fc_ref[H:H + 1, :]                # (1, O)

    # Hoisted input projection for ALL time steps: one (T*B, I) x (I, H) MXU pass,
    # fused RNN bias folded in.  Reshapes only touch leading dims (lane dim intact).
    x_flat = x_ref[...].reshape(T * B, I)
    xproj = (jnp.dot(x_flat, w_ih, preferred_element_type=jnp.float32)
             + b).reshape(T, B, H)

    # Serial recurrence, fully unrolled (T small & static).  xproj[t] is a
    # leading-axis view: nothing but MXU + add + tanh on the critical path.
    h = h0_ref[0]                              # (B, H)
    hs = []
    for t in range(T):
        h = jnp.tanh(xproj[t] + jnp.dot(h, w_hh,
                                        preferred_element_type=jnp.float32))
        hs.append(h)

    # Deferred FC fed directly from vregs (no scratch round trip): stack the hidden
    # history batch-first so the (B*T, H) view matches torch's out.view(B*T, H),
    # then one (B*T, H) x (H, O) matmul + bias and a single output write.
    hs_bt = jnp.stack(hs, axis=1).reshape(B * T, H)           # (B, T, H) -> (B*T, H)
    y = jnp.dot(hs_bt, w_fc, preferred_element_type=jnp.float32) + b_fc
    y_ref[...] = y.astype(y_ref.dtype)


def pack_params(params):
    """One-time parameter packing (outside the per-call path): all transposes,
    casts and the b_ih+b_hh fusion happen here; 6 weight operands -> 2 arrays."""
    H = params["w_ih"].shape[0]
    O = params["w_fc"].shape[0]
    p_rnn = jnp.concatenate(
        [params["w_ih"].T.astype(jnp.float32),                       # (I, H)
         params["w_hh"].T.astype(jnp.float32),                       # (H, H)
         (params["b_ih"] + params["b_hh"]).reshape(1, H).astype(jnp.float32)],
        axis=0)                                                      # (I+H+1, H)
    p_fc = jnp.concatenate(
        [params["w_fc"].T.astype(jnp.float32),                       # (H, O)
         params["b_fc"].reshape(1, O).astype(jnp.float32)],
        axis=0)                                                      # (H+1, O)
    return p_rnn, p_fc


def dinosaur_forward(x, h0, p_rnn, p_fc):
    """x: (B, T, I) batch_first, h0: (1, B, H), packed params.  Returns (B*T, O)."""
    B, T, I = x.shape
    O = p_fc.shape[1]

    # Free layout plumbing on a ~2 KB array: time-major x lets the kernel read each
    # step as a leading-axis view instead of a per-step cross-sublane slice.
    x_tm = jnp.swapaxes(x, 0, 1).astype(jnp.float32)                 # (T, B, I)

    vmem = pl.BlockSpec(memory_space=pltpu.MemorySpace.VMEM)
    y = pl.pallas_call(
        _dino_rnn_fc_kernel,
        out_shape=jax.ShapeDtypeStruct((B * T, O), jnp.float32),
        in_specs=[vmem] * 4,       # whole arrays VMEM-resident; no grid, single TC
        out_specs=vmem,
        # No grid / pl.Buffered: total footprint ~15 KB << scoped VMEM limit on all
        # generations; a T grid axis would only re-add ~0.35 us/step of overhead.
    )(x_tm, h0.astype(jnp.float32), p_rnn, p_fc)
    return y                                                          # (B*T, O)


def _reference_forward(x, h0, params):
    """Pure-JAX reference of the PyTorch forward (for the correctness check)."""
    w_ih, w_hh, b_ih, b_hh, w_fc, b_fc = (
        params["w_ih"], params["w_hh"], params["b_ih"], params["b_hh"],
        params["w_fc"], params["b_fc"])
    B, T, _ = x.shape
    h = h0[0]
    outs = []
    for t in range(T):
        h = jnp.tanh(x[:, t, :] @ w_ih.T + b_ih + h @ w_hh.T + b_hh)
        outs.append(h)
    out = jnp.stack(outs, axis=1)                     # (B, T, H)
    out = out.reshape(B * T, -1)
    return out @ w_fc.T + b_fc


def init_params(key, input_size, hidden_size, output_size):
    """Deterministic init mimicking PyTorch's U(-1/sqrt(H), 1/sqrt(H)) default."""
    ks = jax.random.split(key, 6)
    kr = 1.0 / jnp.sqrt(hidden_size)
    kl = 1.0 / jnp.sqrt(hidden_size)
    return {
        "w_ih": jax.random.uniform(ks[0], (hidden_size, input_size), jnp.float32, -kr, kr),
        "w_hh": jax.random.uniform(ks[1], (hidden_size, hidden_size), jnp.float32, -kr, kr),
        "b_ih": jax.random.uniform(ks[2], (hidden_size,), jnp.float32, -kr, kr),
        "b_hh": jax.random.uniform(ks[3], (hidden_size,), jnp.float32, -kr, kr),
        "w_fc": jax.random.uniform(ks[4], (output_size, hidden_size), jnp.float32, -kl, kl),
        "b_fc": jax.random.uniform(ks[5], (output_size,), jnp.float32, -kl, kl),
    }


if __name__ == "__main__":
    # Small shapes consistent with the module: batch=4, seq=8, input=16,
    # hidden=32, output=16, num_layers=1.
    B, T, I, H, O = 4, 8, 16, 32, 16

    key = jax.random.PRNGKey(0)
    k_x, k_p = jax.random.split(key)
    x = jax.random.normal(k_x, (B, T, I), jnp.float32)
    h0 = jnp.zeros((1, B, H), jnp.float32)            # nn.RNN hidden: (num_layers, B, H)
    params = init_params(k_p, I, H, O)

    # Pack once (init-time), reuse on every forward call.
    p_rnn, p_fc = pack_params(params)

    fwd = jax.jit(dinosaur_forward)
    y = jax.block_until_ready(fwd(x, h0, p_rnn, p_fc))

    y_ref = _reference_forward(x, h0, params)
    assert y.shape == (B * T, O)
    assert jnp.allclose(y, y_ref, atol=1e-5, rtol=1e-5), "mismatch vs reference"

    print("KERNEL_OK")
</pallas_src>

<mosaic_0001>
module attributes {stable_mosaic.version = 11 : i64} {
  func.func @_dino_rnn_fc_kernel(%arg0: memref<8x4x16xf32, #tpu.memory_space<vmem>>, %arg1: memref<1x4x32xf32, #tpu.memory_space<vmem>>, %arg2: memref<49x32xf32, #tpu.memory_space<vmem>>, %arg3: memref<33x16xf32, #tpu.memory_space<vmem>>, %arg4: memref<32x16xf32, #tpu.memory_space<vmem>>) attributes {dimension_semantics = [], scalar_prefetch = 0 : i64, scratch_operands = 0 : i64, tpu.core_type = #tpu.core_type<tc>} {
    %c0 = arith.constant 0 : index
    %c0_0 = arith.constant 0 : index
    %0 = vector.load %arg2[%c0, %c0_0] : memref<49x32xf32, #tpu.memory_space<vmem>>, vector<16x32xf32>
    %c16 = arith.constant 16 : index
    %c0_1 = arith.constant 0 : index
    %1 = vector.load %arg2[%c16, %c0_1] : memref<49x32xf32, #tpu.memory_space<vmem>>, vector<32x32xf32>
    %c48 = arith.constant 48 : index
    %c0_2 = arith.constant 0 : index
    %2 = vector.load %arg2[%c48, %c0_2] : memref<49x32xf32, #tpu.memory_space<vmem>>, vector<1x32xf32>
    %c0_3 = arith.constant 0 : index
    %c0_4 = arith.constant 0 : index
    %3 = vector.load %arg3[%c0_3, %c0_4] : memref<33x16xf32, #tpu.memory_space<vmem>>, vector<32x16xf32>
    %c32 = arith.constant 32 : index
    %c0_5 = arith.constant 0 : index
    %4 = vector.load %arg3[%c32, %c0_5] : memref<33x16xf32, #tpu.memory_space<vmem>>, vector<1x16xf32>
    %c0_6 = arith.constant 0 : index
    %c0_7 = arith.constant 0 : index
    %c0_8 = arith.constant 0 : index
    %5 = vector.load %arg0[%c0_6, %c0_7, %c0_8] : memref<8x4x16xf32, #tpu.memory_space<vmem>>, vector<8x4x16xf32>
    %6 = vector.shape_cast %5 : vector<8x4x16xf32> to vector<32x16xf32>
    %cst = arith.constant dense<0.000000e+00> : vector<32x32xf32>
    %7 = tpu.matmul %6, %0, %cst {dimension_numbers = #tpu.dot_dimension_numbers<[1], [0], [0], [1], [0, 0, 1, 1], [], []>} : vector<32x16xf32>, vector<16x32xf32>, vector<32x32xf32> -> vector<32x32xf32>
    %8 = vector.broadcast %2 : vector<1x32xf32> to vector<32x32xf32>
    %9 = arith.addf %7, %8 : vector<32x32xf32>
    %10 = vector.shape_cast %9 : vector<32x32xf32> to vector<8x4x32xf32>
    %c0_9 = arith.constant 0 : index
    %c0_10 = arith.constant 0 : index
    %c0_11 = arith.constant 0 : index
    %11 = vector.load %arg1[%c0_9, %c0_10, %c0_11] : memref<1x4x32xf32, #tpu.memory_space<vmem>>, vector<1x4x32xf32>
    %12 = vector.shape_cast %11 : vector<1x4x32xf32> to vector<4x32xf32>
    %13 = vector.extract_strided_slice %10 {offsets = [0, 0, 0], sizes = [1, 4, 32], strides = [1, 1, 1]} : vector<8x4x32xf32> to vector<1x4x32xf32>
    %14 = vector.shape_cast %13 : vector<1x4x32xf32> to vector<4x32xf32>
    %cst_12 = arith.constant dense<0.000000e+00> : vector<4x32xf32>
    %15 = tpu.matmul %12, %1, %cst_12 {dimension_numbers = #tpu.dot_dimension_numbers<[1], [0], [0], [1], [0, 0, 1, 1], [], []>} : vector<4x32xf32>, vector<32x32xf32>, vector<4x32xf32> -> vector<4x32xf32>
    %16 = arith.addf %14, %15 : vector<4x32xf32>
    %17 = math.tanh %16 : vector<4x32xf32>
    %18 = vector.extract_strided_slice %10 {offsets = [1, 0, 0], sizes = [1, 4, 32], strides = [1, 1, 1]} : vector<8x4x32xf32> to vector<1x4x32xf32>
    %19 = vector.shape_cast %18 : vector<1x4x32xf32> to vector<4x32xf32>
    %cst_13 = arith.constant dense<0.000000e+00> : vector<4x32xf32>
    %20 = tpu.matmul %17, %1, %cst_13 {dimension_numbers = #tpu.dot_dimension_numbers<[1], [0], [0], [1], [0, 0, 1, 1], [], []>} : vector<4x32xf32>, vector<32x32xf32>, vector<4x32xf32> -> vector<4x32xf32>
    %21 = arith.addf %19, %20 : vector<4x32xf32>
    %22 = math.tanh %21 : vector<4x32xf32>
    %23 = vector.extract_strided_slice %10 {offsets = [2, 0, 0], sizes = [1, 4, 32], strides = [1, 1, 1]} : vector<8x4x32xf32> to vector<1x4x32xf32>
    %24 = vector.shape_cast %23 : vector<1x4x32xf32> to vector<4x32xf32>
    %cst_14 = arith.constant dense<0.000000e+00> : vector<4x32xf32>
    %25 = tpu.matmul %22, %1, %cst_14 {dimension_numbers = #tpu.dot_dimension_numbers<[1], [0], [0], [1], [0, 0, 1, 1], [], []>} : vector<4x32xf32>, vector<32x32xf32>, vector<4x32xf32> -> vector<4x32xf32>
    %26 = arith.addf %24, %25 : vector<4x32xf32>
    %27 = math.tanh %26 : vector<4x32xf32>
    %28 = vector.extract_strided_slice %10 {offsets = [3, 0, 0], sizes = [1, 4, 32], strides = [1, 1, 1]} : vector<8x4x32xf32> to vector<1x4x32xf32>
    %29 = vector.shape_cast %28 : vector<1x4x32xf32> to vector<4x32xf32>
    %cst_15 = arith.constant dense<0.000000e+00> : vector<4x32xf32>
    %30 = tpu.matmul %27, %1, %cst_15 {dimension_numbers = #tpu.dot_dimension_numbers<[1], [0], [0], [1], [0, 0, 1, 1], [], []>} : vector<4x32xf32>, vector<32x32xf32>, vector<4x32xf32> -> vector<4x32xf32>
    %31 = arith.addf %29, %30 : vector<4x32xf32>
    %32 = math.tanh %31 : vector<4x32xf32>
    %33 = vector.extract_strided_slice %10 {offsets = [4, 0, 0], sizes = [1, 4, 32], strides = [1, 1, 1]} : vector<8x4x32xf32> to vector<1x4x32xf32>
    %34 = vector.shape_cast %33 : vector<1x4x32xf32> to vector<4x32xf32>
    %cst_16 = arith.constant dense<0.000000e+00> : vector<4x32xf32>
    %35 = tpu.matmul %32, %1, %cst_16 {dimension_numbers = #tpu.dot_dimension_numbers<[1], [0], [0], [1], [0, 0, 1, 1], [], []>} : vector<4x32xf32>, vector<32x32xf32>, vector<4x32xf32> -> vector<4x32xf32>
    %36 = arith.addf %34, %35 : vector<4x32xf32>
    %37 = math.tanh %36 : vector<4x32xf32>
    %38 = vector.extract_strided_slice %10 {offsets = [5, 0, 0], sizes = [1, 4, 32], strides = [1, 1, 1]} : vector<8x4x32xf32> to vector<1x4x32xf32>
    %39 = vector.shape_cast %38 : vector<1x4x32xf32> to vector<4x32xf32>
    %cst_17 = arith.constant dense<0.000000e+00> : vector<4x32xf32>
    %40 = tpu.matmul %37, %1, %cst_17 {dimension_numbers = #tpu.dot_dimension_numbers<[1], [0], [0], [1], [0, 0, 1, 1], [], []>} : vector<4x32xf32>, vector<32x32xf32>, vector<4x32xf32> -> vector<4x32xf32>
    %41 = arith.addf %39, %40 : vector<4x32xf32>
    %42 = math.tanh %41 : vector<4x32xf32>
    %43 = vector.extract_strided_slice %10 {offsets = [6, 0, 0], sizes = [1, 4, 32], strides = [1, 1, 1]} : vector<8x4x32xf32> to vector<1x4x32xf32>
    %44 = vector.shape_cast %43 : vector<1x4x32xf32> to vector<4x32xf32>
    %cst_18 = arith.constant dense<0.000000e+00> : vector<4x32xf32>
    %45 = tpu.matmul %42, %1, %cst_18 {dimension_numbers = #tpu.dot_dimension_numbers<[1], [0], [0], [1], [0, 0, 1, 1], [], []>} : vector<4x32xf32>, vector<32x32xf32>, vector<4x32xf32> -> vector<4x32xf32>
    %46 = arith.addf %44, %45 : vector<4x32xf32>
    %47 = math.tanh %46 : vector<4x32xf32>
    %48 = vector.extract_strided_slice %10 {offsets = [7, 0, 0], sizes = [1, 4, 32], strides = [1, 1, 1]} : vector<8x4x32xf32> to vector<1x4x32xf32>
    %49 = vector.shape_cast %48 : vector<1x4x32xf32> to vector<4x32xf32>
    %cst_19 = arith.constant dense<0.000000e+00> : vector<4x32xf32>
    %50 = tpu.matmul %47, %1, %cst_19 {dimension_numbers = #tpu.dot_dimension_numbers<[1], [0], [0], [1], [0, 0, 1, 1], [], []>} : vector<4x32xf32>, vector<32x32xf32>, vector<4x32xf32> -> vector<4x32xf32>
    %51 = arith.addf %49, %50 : vector<4x32xf32>
    %52 = math.tanh %51 : vector<4x32xf32>
    %53 = vector.shape_cast %17 : vector<4x32xf32> to vector<4x1x32xf32>
    %54 = vector.shape_cast %22 : vector<4x32xf32> to vector<4x1x32xf32>
    %55 = vector.shape_cast %27 : vector<4x32xf32> to vector<4x1x32xf32>
    %56 = vector.shape_cast %32 : vector<4x32xf32> to vector<4x1x32xf32>
    %57 = vector.shape_cast %37 : vector<4x32xf32> to vector<4x1x32xf32>
    %58 = vector.shape_cast %42 : vector<4x32xf32> to vector<4x1x32xf32>
    %59 = vector.shape_cast %47 : vector<4x32xf32> to vector<4x1x32xf32>
    %60 = vector.shape_cast %52 : vector<4x32xf32> to vector<4x1x32xf32>
    %61 = tpu.concatenate %53, %54, %55, %56, %57, %58, %59, %60 in 1 : vector<4x1x32xf32>, vector<4x1x32xf32>, vector<4x1x32xf32>, vector<4x1x32xf32>, vector<4x1x32xf32>, vector<4x1x32xf32>, vector<4x1x32xf32>, vector<4x1x32xf32> -> vector<4x8x32xf32>
    %62 = vector.shape_cast %61 : vector<4x8x32xf32> to vector<32x32xf32>
    %cst_20 = arith.constant dense<0.000000e+00> : vector<32x16xf32>
    %63 = tpu.matmul %62, %3, %cst_20 {dimension_numbers = #tpu.dot_dimension_numbers<[1], [0], [0], [1], [0, 0, 1, 1], [], []>} : vector<32x32xf32>, vector<32x16xf32>, vector<32x16xf32> -> vector<32x16xf32>
    %64 = vector.broadcast %4 : vector<1x16xf32> to vector<32x16xf32>
    %65 = arith.addf %63, %64 : vector<32x16xf32>
    %c0_21 = arith.constant 0 : index
    %c0_22 = arith.constant 0 : index
    %66 = vector.load %arg4[%c0_21, %c0_22] : memref<32x16xf32, #tpu.memory_space<vmem>>, vector<32x16xf32>
    tpu.vector_store %arg4[%c0_21, %c0_22], %65 {strides = array<i32>} : memref<32x16xf32, #tpu.memory_space<vmem>>, vector<32x16xf32>,
    return
  }
}

</mosaic_0001>

<bundles_post_ra>
// kernel: dinosaur_forward.1
= control target key start
LH: loop header
LB: loop body
LE: loop exit
PB: predicated region body
PF: predicated region fallthrough
CT: control target
= control target key end

     0   :  { %vm116_vm0 = vcmask 261120   ;;  %vm65_vm1 = vcmask 130048   ;;  %vm320_vm2 = vcmask 1041409   ;;  %vm323_vm3 = vcmask 1042434   ;;  %s778_s2 = inlined_call_operand.vmem [shape: f32[49,32], index: 2, kind: input, shape index: {}]   ;;  %s779_s0 = inlined_call_operand.vmem [shape: f32[8,4,16], index: 0, kind: input, shape index: {}]   ;;  %s780_s1 = inlined_call_operand.vmem [shape: f32[1,4,32], index: 1, kind: input, shape index: {}]   ;;  %s781_s3 = inlined_call_operand.vmem [shape: f32[33,16], index: 3, kind: input, shape index: {}]   ;;  %s782_s4 = inlined_call_operand.vmem [shape: f32[32,16], index: 4, kind: output, shape index: {}]  }
   0x1   :  { %v592_v0 = vld [vmem:[%s778_s2 + $0x28] sm:$0xff]  ;;  %v600_v2 = vld [vmem:[%s778_s2 + $0x20] sm:$0xff]  ;;  %v612_v5 = vld [vmem:[%s778_s2 + $0x18] sm:$0xff]  ;;  %vm326_vm4 = vcmask 1043459   ;;  %vm318_vm5 = vcmask 1040384   ;;  %vm450_vm6 = vcmask 1041408  }
   0x2   :  { %v18_v1 = vld [vmem:[%s778_s2 + $0x8] sm:$0xff]  ;;  %132 = vmatpush.msra.mxu1 %v592_v0  ;;  %v17_v3 = vld [vmem:[%s778_s2] sm:$0xff]  ;;  %157 = vmatpush.msra.mxu2 %v592_v0  ;;  %v622_v7 = vld [vmem:[%s778_s2 + $0x10] sm:$0xff]  ;;  %vm455_vm7 = vcmask 1042432   ;;  %vm460_vm8 = vcmask 1043456   ;;  %vm465_vm9 = vcmask 1044480  }
   0x3   :  { %88 = vmatpush.msra.mxu0 %v18_v1  ;;  %v29_v4 = vld [vmem:[%s779_s0] sm:$0xf]  ;;  %v30_v6 = vld [vmem:[%s779_s0 + $0x4] sm:$0xf]  ;;  %v649_v10 = vld [vmem:[%s778_s2 + $0x30] ss:$0 sm:$0xff] }
   0x4   :  { %46 = vst [vmem:[#allocation1] ss:$2 sm:$0xff] %v29_v4  ;;  %133 = vmatpush.msra.mxu1 %v600_v2  ;;  %158 = vmatpush.msra.mxu2 %v600_v2  ;;  %v115_v8 = vld [vmem:[%s780_s1] sm:$0xf]  ;;  %v31_v16 = vld [vmem:[%s779_s0 + $0x8] sm:$0xf] }
   0x5   :  { %89 = vmatpush.msra.mxu0 %v17_v3  ;;  %48 = vst [vmem:[#allocation1 + $0x1] ss:$2 sm:$0xff] %v30_v6  ;;  %v32_v17 = vld [vmem:[%s779_s0 + $0xc] sm:$0xf]  ;;  %vm470_vm10 = vcmask 1045504   ;;  %vm475_vm11 = vcmask 1046528  }
   0x6   :  { %134 = vmatpush.msra.mxu1 %v612_v5  ;;  %159 = vmatpush.msra.mxu2 %v612_v5  ;;  %50 = vst [vmem:[#allocation1 + $0x10] ss:$2 sm:$0xff] %v31_v16 }
   0x7   :  { %52 = vst [vmem:[#allocation1 + $0x11] ss:$2 sm:$0xff] %v32_v17 }
   0x8   :  { %135 = vmatpush.msra.mxu1 %v622_v7  ;;  %160 = vmatpush.msra.mxu2 %v622_v7 }
   0x9   :  { %534 = vmatmul.msk.f32.vlgmr.msra.gmra.mxu1 %vm116_vm0, %v115_v8  ;;  %v33_v8 = vld [vmem:[%s779_s0 + $0x10] sm:$0xf] }
   0xa   :  { %182 = vmatpush.msrb.mxu1 %v592_v0  ;;  %232 = vmatpush.msrb.mxu2 %v592_v0  ;;  %54 = vst [vmem:[#allocation1 + $0x20] ss:$2 sm:$0xff] %v33_v8 }
   0xc   :  { %v61_v9 = vld.sshfl [vmem:[#allocation1] sm:$0xff pattern:$0x75316420]  ;;  %183 = vmatpush.msrb.mxu1 %v600_v2  ;;  %233 = vmatpush.msrb.mxu2 %v600_v2 }
   0xd   :  { %530 = vmatmul.msk.f32.vlgmr.msra.gmra.mxu0 %vm65_vm1, %v61_v9  ;;  %v34_v9 = vld [vmem:[%s779_s0 + $0x14] sm:$0xf] }
   0xe   :  { %184 = vmatpush.msrb.mxu1 %v612_v5  ;;  %234 = vmatpush.msrb.mxu2 %v612_v5  ;;  %v62_v18 = vld.sshfl [vmem:[#allocation1 + $0x10] sm:$0xff pattern:$0x75316420]  ;;  %56 = vst [vmem:[#allocation1 + $0x21] ss:$2 sm:$0xff] %v34_v9 }
  0x10   :  { %185 = vmatpush.msrb.mxu1 %v622_v7  ;;  %235 = vmatpush.msrb.mxu2 %v622_v7 }
  0x12   :  { %207 = vmatpush.msra.mxu1 %v592_v0 }
  0x14   :  { %208 = vmatpush.msra.mxu1 %v600_v2 }
  0x15   :  { %531 = vmatmul.msk.f32.gmra.mxu0 %vm65_vm1, %v62_v18 }
  0x16   :  { %209 = vmatpush.msra.mxu1 %v612_v5 }
  0x18   :  { %210 = vmatpush.msra.mxu1 %v622_v7 }
  0x86   :  { %v137_v12 = vpop.f32.mrf.mxu1 }
  0x8a   :  { %v91_v11 = vpop.f32.mrf.mxu0 }
  0x8b   :  { %v92_v13 = vadd.f32 %v649_v10, %v91_v11  ;;  %v63_v11 = vld.sshfl [vmem:[#allocation1 + $0x20] sm:$0xff pattern:$0x75316420] }
  0x8c   :  { %532 = vmatmul.msk.f32.gmra.mxu0 %vm65_vm1, %v63_v11 }
  0x8d   :  { %v140_v14 = vadd.f32 %v137_v12, %v92_v13  ;;  %v107_v19 = vrot.slane %v92_v13, 4 }
  0x8f   :  { %548 = vtanh.f32 %v140_v14 }
  0x92   :  { %v94_v47 = vpop.f32.mrf.mxu0 }
  0x93   :  { %v95_v48 = vadd.f32 %v649_v10, %v94_v47 }
  0x95   :  { %v549_v15 = vpop.eup %548  ;;  %v108_v12 = vrot.slane %v95_v48, 4 }
  0x96   :  { %535 = vmatmul.msk.f32.vlgmr.msra.gmra.mxu2 %vm116_vm0, %v549_v15  ;;  %v317_v22 = vrot.slane %v549_v15, 3 }
  0x97   :  { %257 = vmatpush.msra.mxu2 %v592_v0 }
  0x98   :  { %v321_v25 = vsel %vm320_vm2, %v549_v15, %v317_v22  ;;  %v324_v26 = vsel %vm323_vm3, %v549_v15, %v317_v22  ;;  %v327_v27 = vsel %vm326_vm4, %v549_v15, %v317_v22  ;;  %v319_v36 = vsel %vm318_vm5, %v549_v15, %v317_v22 }
  0x99   :  { %258 = vmatpush.msra.mxu2 %v600_v2  ;;  %v322_v37 = vrot.slane %v321_v25, 1  ;;  %v325_v38 = vrot.slane %v324_v26, 2  ;;  %v328_v39 = vrot.slane %v327_v27, 3 }
  0x9b   :  { %259 = vmatpush.msra.mxu2 %v612_v5 }
  0x9d   :  { %260 = vmatpush.msra.mxu2 %v622_v7 }
 0x119   :  { %v162_v20 = vpop.f32.mrf.mxu2 }
 0x11a   :  { %v165_v21 = vadd.f32 %v162_v20, %v107_v19 }
 0x11c   :  { %550 = vtanh.f32 %v165_v21 }
 0x122   :  { %v551_v23 = vpop.eup %550 }
 0x123   :  { %536 = vmatmul.msk.f32.vlgmr.msrb.gmra.mxu1 %vm116_vm0, %v551_v23  ;;  %v333_v24 = vrot.slane %v551_v23, 3 }
 0x124   :  { %282 = vmatpush.msrb.mxu1 %v592_v0 }
 0x125   :  { %v334_v28 = vsel %vm318_vm5, %v551_v23, %v333_v24  ;;  %v335_v29 = vsel %vm320_vm2, %v551_v23, %v333_v24  ;;  %v337_v30 = vsel %vm323_vm3, %v551_v23, %v333_v24  ;;  %v339_v31 = vsel %vm326_vm4, %v551_v23, %v333_v24 }
 0x126   :  { %283 = vmatpush.msrb.mxu1 %v600_v2  ;;  %v390_v32 = vperm.slane %v334_v28, 0  ;;  %v336_v33 = vrot.slane %v335_v29, 1  ;;  %v338_v34 = vrot.slane %v337_v30, 2  ;;  %v340_v35 = vrot.slane %v339_v31, 3 }
 0x128   :  { %284 = vmatpush.msrb.mxu1 %v612_v5  ;;  %v446_v40 = vsel %vm318_vm5, %v319_v36, %v390_v32  ;;  %v391_v41 = vperm.slane %v336_v33, 0  ;;  %v392_v42 = vperm.slane %v338_v34, 0  ;;  %v393_v43 = vperm.slane %v340_v35, 0 }
 0x12a   :  { %285 = vmatpush.msrb.mxu1 %v622_v7  ;;  %v447_v44 = vsel %vm318_vm5, %v322_v37, %v391_v41  ;;  %v448_v45 = vsel %vm318_vm5, %v325_v38, %v392_v42  ;;  %v449_v46 = vsel %vm318_vm5, %v328_v39, %v393_v43 }
 0x1a0   :  { %v187_v49 = vpop.f32.mrf.mxu1 }
 0x1a1   :  { %v190_v50 = vadd.f32 %v187_v49, %v95_v48  ;;  %v35_v49 = vld [vmem:[%s779_s0 + $0x18] sm:$0xf] }
 0x1a2   :  { %58 = vst [vmem:[#allocation1 + $0x30] ss:$2 sm:$0xff] %v35_v49 }
 0x1a3   :  { %552 = vtanh.f32 %v190_v50  ;;  %v36_v50 = vld [vmem:[%s779_s0 + $0x1c] sm:$0xf] }
 0x1a4   :  { %60 = vst [vmem:[#allocation1 + $0x31] ss:$2 sm:$0xff] %v36_v50 }
 0x1a9   :  { %v553_v51 = vpop.eup %552 }
 0x1aa   :  { %537 = vmatmul.msk.f32.vlgmr.msra.gmra.mxu1 %vm116_vm0, %v553_v51  ;;  %v341_v52 = vrot.slane %v553_v51, 3 }
 0x1ac   :  { %v342_v53 = vsel %vm318_vm5, %v553_v51, %v341_v52  ;;  %v343_v54 = vsel %vm320_vm2, %v553_v51, %v341_v52  ;;  %v345_v55 = vsel %vm323_vm3, %v553_v51, %v341_v52  ;;  %v347_v56 = vsel %vm326_vm4, %v553_v51, %v341_v52  ;;  %v64_v51 = vld.sshfl [vmem:[#allocation1 + $0x30] sm:$0xff pattern:$0x75316420] }
 0x1ad   :  { %v398_v57 = vperm.slane %v342_v53, 0  ;;  %v344_v58 = vrot.slane %v343_v54, 1  ;;  %v346_v59 = vrot.slane %v345_v55, 2  ;;  %v348_v60 = vrot.slane %v347_v56, 3  ;;  %533 = vmatmul.msk.f32.gmra.mxu0 %vm65_vm1, %v64_v51 }
 0x1af   :  { %v451_v61 = vsel %vm450_vm6, %v446_v40, %v398_v57  ;;  %v399_v62 = vperm.slane %v344_v58, 0  ;;  %v400_v63 = vperm.slane %v346_v59, 0  ;;  %v401_v1 = vperm.slane %v348_v60, 0 }
 0x1b1   :  { %v452_v3 = vsel %vm450_vm6, %v447_v44, %v399_v62  ;;  %v453_v4 = vsel %vm450_vm6, %v448_v45, %v400_v63  ;;  %v454_v6 = vsel %vm450_vm6, %v449_v46, %v401_v1 }
 0x227   :  { %v212_v13 = vpop.f32.mrf.mxu1 }
 0x228   :  { %v215_v14 = vadd.f32 %v212_v13, %v108_v12 }
 0x22a   :  { %554 = vtanh.f32 %v215_v14 }
 0x230   :  { %v555_v15 = vpop.eup %554 }
 0x231   :  { %538 = vmatmul.msk.f32.vlgmr.msrb.gmra.mxu2 %vm116_vm0, %v555_v15  ;;  %v349_v16 = vrot.slane %v555_v15, 3 }
 0x232   :  { %307 = vmatpush.msrb.mxu2 %v592_v0 }
 0x233   :  { %v350_v17 = vsel %vm318_vm5, %v555_v15, %v349_v16  ;;  %v351_v18 = vsel %vm320_vm2, %v555_v15, %v349_v16  ;;  %v353_v19 = vsel %vm323_vm3, %v555_v15, %v349_v16  ;;  %v355_v20 = vsel %vm326_vm4, %v555_v15, %v349_v16 }
 0x234   :  { %308 = vmatpush.msrb.mxu2 %v600_v2  ;;  %v406_v21 = vperm.slane %v350_v17, 0  ;;  %v352_v22 = vrot.slane %v351_v18, 1  ;;  %v354_v23 = vrot.slane %v353_v19, 2  ;;  %v356_v24 = vrot.slane %v355_v20, 3  ;;  %v97_v2 = vpop.f32.mrf.mxu0 }
 0x235   :  { %v98_v31 = vadd.f32 %v649_v10, %v97_v2 }
 0x236   :  { %309 = vmatpush.msrb.mxu2 %v612_v5  ;;  %v456_v25 = vsel %vm455_vm7, %v451_v61, %v406_v21  ;;  %v407_v0 = vperm.slane %v352_v22, 0  ;;  %v408_v26 = vperm.slane %v354_v23, 0  ;;  %v409_v27 = vperm.slane %v356_v24, 0 }
 0x237   :  { %v109_v52 = vrot.slane %v98_v31, 4 }
 0x238   :  { %310 = vmatpush.msrb.mxu2 %v622_v7  ;;  %v457_v28 = vsel %vm455_vm7, %v452_v3, %v407_v0  ;;  %v458_v29 = vsel %vm455_vm7, %v453_v4, %v408_v26  ;;  %v459_v30 = vsel %vm455_vm7, %v454_v6, %v409_v27 }
 0x23c   :  { %v100_v13 = vpop.f32.mrf.mxu0 }
 0x23d   :  { %v101_v14 = vadd.f32 %v649_v10, %v100_v13 }
 0x2b4   :  { %v237_v32 = vpop.f32.mrf.mxu2 }
 0x2b5   :  { %v240_v33 = vadd.f32 %v237_v32, %v98_v31  ;;  %v27_v31 = vld [vmem:[%s781_s3 + $0x18] sm:$0xff]  ;;  %v26_v32 = vld [vmem:[%s781_s3 + $0x10] sm:$0xff] }
 0x2b6   :  { %505 = vmatpush.msra.mxu3 %v27_v31 }
 0x2b7   :  { %556 = vtanh.f32 %v240_v33  ;;  %v25_v33 = vld [vmem:[%s781_s3 + $0x8] sm:$0xff] }
 0x2b8   :  { %506 = vmatpush.msra.mxu3 %v26_v32 }
 0x2ba   :  { %507 = vmatpush.msra.mxu3 %v25_v33 }
 0x2bd   :  { %v557_v5 = vpop.eup %556 }
 0x2be   :  { %539 = vmatmul.msk.f32.vlgmr.msra.gmra.mxu2 %vm116_vm0, %v557_v5  ;;  %v357_v34 = vrot.slane %v557_v5, 3 }
 0x2c0   :  { %v358_v35 = vsel %vm318_vm5, %v557_v5, %v357_v34  ;;  %v359_v7 = vsel %vm320_vm2, %v557_v5, %v357_v34  ;;  %v361_v36 = vsel %vm323_vm3, %v557_v5, %v357_v34  ;;  %v363_v37 = vsel %vm326_vm4, %v557_v5, %v357_v34  ;;  %v24_v5 = vld [vmem:[%s781_s3] sm:$0xff] }
 0x2c1   :  { %v414_v38 = vperm.slane %v358_v35, 0  ;;  %v360_v39 = vrot.slane %v359_v7, 1  ;;  %v362_v40 = vrot.slane %v361_v36, 2  ;;  %v364_v41 = vrot.slane %v363_v37, 3  ;;  %508 = vmatpush.msra.mxu3 %v24_v5 }
 0x2c2   :  { %v110_v34 = vrot.slane %v101_v14, 4 }
 0x2c3   :  { %v461_v42 = vsel %vm460_vm8, %v456_v25, %v414_v38  ;;  %v415_v43 = vperm.slane %v360_v39, 0  ;;  %v416_v44 = vperm.slane %v362_v40, 0  ;;  %v417_v45 = vperm.slane %v364_v41, 0 }
 0x2c5   :  { %v462_v46 = vsel %vm460_vm8, %v457_v28, %v415_v43  ;;  %v463_v47 = vsel %vm460_vm8, %v458_v29, %v416_v44  ;;  %v464_v48 = vsel %vm460_vm8, %v459_v30, %v417_v45 }
 0x341   :  { %v262_v53 = vpop.f32.mrf.mxu2 }
 0x342   :  { %v265_v54 = vadd.f32 %v262_v53, %v109_v52  ;;  %v547_v53 = vld [vmem:[%s781_s3 + $0x20] ss:$0 sm:$0xff] }
 0x344   :  { %558 = vtanh.f32 %v265_v54 }
 0x34a   :  { %v559_v55 = vpop.eup %558 }
 0x34b   :  { %540 = vmatmul.msk.f32.vlgmr.msrb.gmra.mxu1 %vm116_vm0, %v559_v55  ;;  %v365_v56 = vrot.slane %v559_v55, 3 }
 0x34d   :  { %v366_v57 = vsel %vm318_vm5, %v559_v55, %v365_v56  ;;  %v367_v58 = vsel %vm320_vm2, %v559_v55, %v365_v56  ;;  %v369_v59 = vsel %vm323_vm3, %v559_v55, %v365_v56  ;;  %v371_v60 = vsel %vm326_vm4, %v559_v55, %v365_v56 }
 0x34e   :  { %v422_v61 = vperm.slane %v366_v57, 0  ;;  %v368_v62 = vrot.slane %v367_v58, 1  ;;  %v370_v63 = vrot.slane %v369_v59, 2  ;;  %v372_v1 = vrot.slane %v371_v60, 3 }
 0x350   :  { %v466_v3 = vsel %vm465_vm9, %v461_v42, %v422_v61  ;;  %v423_v4 = vperm.slane %v368_v62, 0  ;;  %v424_v6 = vperm.slane %v370_v63, 0  ;;  %v425_v8 = vperm.slane %v372_v1, 0 }
 0x352   :  { %v467_v9 = vsel %vm465_vm9, %v462_v46, %v423_v4  ;;  %v468_v11 = vsel %vm465_vm9, %v463_v47, %v424_v6  ;;  %v469_v12 = vsel %vm465_vm9, %v464_v48, %v425_v8 }
 0x3c8   :  { %v287_v15 = vpop.f32.mrf.mxu1 }
 0x3c9   :  { %v290_v16 = vadd.f32 %v287_v15, %v101_v14 }
 0x3cb   :  { %560 = vtanh.f32 %v290_v16 }
 0x3d1   :  { %v561_v17 = vpop.eup %560 }
 0x3d2   :  { %541 = vmatmul.msk.f32.vlgmr.msrb.gmra.mxu2 %vm116_vm0, %v561_v17  ;;  %v373_v18 = vrot.slane %v561_v17, 3 }
 0x3d4   :  { %v374_v19 = vsel %vm318_vm5, %v561_v17, %v373_v18  ;;  %v375_v20 = vsel %vm320_vm2, %v561_v17, %v373_v18  ;;  %v377_v21 = vsel %vm323_vm3, %v561_v17, %v373_v18  ;;  %v379_v22 = vsel %vm326_vm4, %v561_v17, %v373_v18 }
 0x3d5   :  { %v430_v23 = vperm.slane %v374_v19, 0  ;;  %v376_v24 = vrot.slane %v375_v20, 1  ;;  %v378_v25 = vrot.slane %v377_v21, 2  ;;  %v380_v10 = vrot.slane %v379_v22, 3 }
 0x3d7   :  { %v471_v0 = vsel %vm470_vm10, %v466_v3, %v430_v23  ;;  %v431_v26 = vperm.slane %v376_v24, 0  ;;  %v432_v27 = vperm.slane %v378_v25, 0  ;;  %v433_v28 = vperm.slane %v380_v10, 0 }
 0x3d9   :  { %v472_v29 = vsel %vm470_vm10, %v467_v9, %v431_v26  ;;  %v473_v30 = vsel %vm470_vm10, %v468_v11, %v432_v27  ;;  %v474_v2 = vsel %vm470_vm10, %v469_v12, %v433_v28 }
 0x455   :  { %v312_v35 = vpop.f32.mrf.mxu2 }
 0x456   :  { %v315_v7 = vadd.f32 %v312_v35, %v110_v34 }
 0x458   :  { %562 = vtanh.f32 %v315_v7 }
 0x45e   :  { %v563_v36 = vpop.eup %562 }
 0x45f   :  { %v382_v37 = vrot.slane %v563_v36, 3 }
 0x461   :  { %v383_v38 = vsel %vm318_vm5, %v563_v36, %v382_v37  ;;  %v384_v39 = vsel %vm320_vm2, %v563_v36, %v382_v37  ;;  %v386_v40 = vsel %vm323_vm3, %v563_v36, %v382_v37  ;;  %v388_v41 = vsel %vm326_vm4, %v563_v36, %v382_v37 }
 0x462   :  { %v438_v42 = vperm.slane %v383_v38, 0  ;;  %v385_v43 = vrot.slane %v384_v39, 1  ;;  %v387_v44 = vrot.slane %v386_v40, 2  ;;  %v389_v45 = vrot.slane %v388_v41, 3 }
 0x464   :  { %v476_v46 = vsel %vm475_vm11, %v471_v0, %v438_v42  ;;  %v439_v47 = vperm.slane %v385_v43, 0  ;;  %v440_v48 = vperm.slane %v387_v44, 0  ;;  %v441_v49 = vperm.slane %v389_v45, 0 }
 0x465   :  { %542 = vmatmul.msk.f32.vlgmr.msra.gmra.mxu3 %vm116_vm0, %v476_v46 }
 0x466   :  { %v477_v50 = vsel %vm475_vm11, %v472_v29, %v439_v47  ;;  %v478_v51 = vsel %vm475_vm11, %v473_v30, %v440_v48  ;;  %v479_v52 = vsel %vm475_vm11, %v474_v2, %v441_v49 }
 0x46d   :  { %543 = vmatmul.msk.f32.gmra.mxu3 %vm116_vm0, %v477_v50 }
 0x475   :  { %544 = vmatmul.msk.f32.gmra.mxu3 %vm116_vm0, %v478_v51 }
 0x47d   :  { %545 = vmatmul.msk.f32.gmra.mxu3 %vm116_vm0, %v479_v52 }
 0x4e8   :  { %v510_v54 = vpop.f32.mrf.mxu3 }
 0x4e9   :  { %v511_v55 = vadd.f32 %v547_v53, %v510_v54 }
 0x4eb   :  { %522 = vst.msk [vmem:[%s782_s4] sm:$0xff] %vm65_vm1, %v511_v55 }
 0x4f0   :  { %v513_v56 = vpop.f32.mrf.mxu3 }
 0x4f1   :  { %v514_v57 = vadd.f32 %v547_v53, %v513_v56 }
 0x4f3   :  { %523 = vst.msk [vmem:[%s782_s4 + $0x8] sm:$0xff] %vm65_vm1, %v514_v57 }
 0x4f8   :  { %v516_v58 = vpop.f32.mrf.mxu3 }
 0x4f9   :  { %v517_v59 = vadd.f32 %v547_v53, %v516_v58 }
 0x4fb   :  { %524 = vst.msk [vmem:[%s782_s4 + $0x10] sm:$0xff] %vm65_vm1, %v517_v59 }
 0x500   :  { %v519_v60 = vpop.f32.mrf.mxu3 }
 0x501   :  { %v520_v61 = vadd.f32 %v547_v53, %v519_v60 }
 0x503   :  { %525 = vst.msk [vmem:[%s782_s4 + $0x18] sm:$0xff] %vm65_vm1, %v520_v61 }

</bundles_post_ra>
